<compile_context>
chip_gen: v6e
topology: v6e:2x2x1
jax: 0.10.0
libtpu: 0.0.40
codegen_flags: <defaults>
</compile_context>

<pallas_src>
import jax
import jax.numpy as jnp
from jax.experimental import pallas as pl

# ----------------------------- model dims -----------------------------------
N = 2                          # batch
CIN = 3                        # in_channels (module default)
H = W = 16                     # spatial
KH = KW = 3                    # conv-stem kernel
HO, WO = H - KH + 1, W - KW + 1
P = HO * WO                    # 196 patches per image
K_RAW = KH * KW * CIN          # 27 im2col depth
K_PAD = 32                     # zero-padded contraction depth (lane-friendly)
F_BACKBONE = 32                # stand-in backbone feature dim (feeds LazyLinear)
D1 = 128                       # dense1 out
META_DIM = 12                  # 128 + 12 = 140 = dense2 in_features
D2, D3, FC_DIM = 64, 32, 1


# ------------------------ single fused Pallas kernel -------------------------
def use_meta_kernel(x_ref, pool_ref, wconv_ref, bconv_ref, meta_ref,
                    w1_ref, b1_ref, w2f_ref, w2m_ref, b2_ref,
                    w3_ref, b3_ref, w4_ref, b4_ref,
                    out_ref, feature_ref):
    # x_ref    : (N*P, K_PAD) im2col columns, all images stacked
    # pool_ref : (N, N*P)     per-image mean-pool matrix (1/P on own rows)
    # wconv_ref: (K_PAD, F)   conv-stem weight (flattened, transposed, 0-padded)
    # --- backbone stand-in: conv-as-matmul -> ReLU -> global average pool ---
    z = jnp.dot(x_ref[...], wconv_ref[...], preferred_element_type=jnp.float32)
    z = jnp.maximum(z + bconv_ref[...], 0.0)                       # (N*P, F)
    feat = jnp.dot(pool_ref[...], z,
                   preferred_element_type=jnp.float32)             # (N, F)

    # --- dense1 (LazyLinear F_BACKBONE -> 128) ---
    feature = jnp.dot(feat, w1_ref[...],
                      preferred_element_type=jnp.float32) + b1_ref[...]
    feature_ref[...] = feature.astype(feature_ref.dtype)           # (N, 128)

    # --- dense2 on concat([feature, meta]) == split matmul (no lane concat) ---
    h2 = (jnp.dot(feature, w2f_ref[...], preferred_element_type=jnp.float32)
          + jnp.dot(meta_ref[...], w2m_ref[...],
                    preferred_element_type=jnp.float32)
          + b2_ref[...])                                           # (N, 64)

    # --- dense3 (64 -> 32) ---
    h3 = jnp.dot(h2, w3_ref[...],
                 preferred_element_type=jnp.float32) + b3_ref[...]  # (N, 32)

    # --- dense4 (32 -> 1): VPU broadcast-mul + lane reduction, no 1-wide MXU ---
    out = jnp.sum(h3 * w4_ref[...], axis=-1, keepdims=True) + b4_ref[...]
    out_ref[...] = out.astype(out_ref.dtype)                       # (N, 1)


def use_meta_forward(img, meta, params):
    """Mirrors UseMeta.forward: returns (output, feature, meta)."""
    # --- glue: im2col (NCHW -> (N*P, K_PAD) columns, zero-padded lanes) ------
    x = jnp.transpose(img, (0, 2, 3, 1))                    # NHWC
    cols = []
    for ky in range(KH):
        for kx in range(KW):
            cols.append(x[:, ky:ky + HO, kx:kx + WO, :])    # (N, HO, WO, CIN)
    x_cols = jnp.concatenate(cols, axis=-1).reshape(N * P, K_RAW)
    x_cols = jnp.pad(x_cols, ((0, 0), (0, K_PAD - K_RAW)))  # (N*P, 32)

    # per-image mean-pool matrix: pool[i, j] = 1/P if row j belongs to image i
    row_img = jnp.repeat(jnp.arange(N), P)                  # (N*P,)
    pool = (jnp.arange(N)[:, None] == row_img[None, :]).astype(jnp.float32) / P

    args = (x_cols, pool, params["w_conv"], params["b_conv"], meta,
            params["w1"], params["b1"],
            params["w2_feat"], params["w2_meta"], params["b2"],
            params["w3"], params["b3"],
            params["w4_row"], params["b4"])

    flops = 2 * (N * P * K_PAD * F_BACKBONE          # conv-as-matmul
                 + N * (N * P) * F_BACKBONE          # pooling matmul
                 + N * F_BACKBONE * D1               # dense1
                 + N * D1 * D2 + N * META_DIM * D2   # dense2 (split)
                 + N * D2 * D3                       # dense3
                 + N * D3 * FC_DIM)                  # dense4
    bytes_accessed = 4 * (sum(int(a.size) for a in args)
                          + N * FC_DIM + N * D1)

    output, feature = pl.pallas_call(
        use_meta_kernel,
        out_shape=(jax.ShapeDtypeStruct((N, FC_DIM), jnp.float32),
                   jax.ShapeDtypeStruct((N, D1), jnp.float32)),
        cost_estimate=pl.CostEstimate(flops=flops, transcendentals=0,
                                      bytes_accessed=bytes_accessed),
    )(*args)
    return output, feature, meta


# ------------------------------- params --------------------------------------
def xavier_normal(key, fan_in, fan_out):
    std = (2.0 / (fan_in + fan_out)) ** 0.5
    return std * jax.random.normal(key, (fan_in, fan_out), jnp.float32)


def init_params(key):
    ks = jax.random.split(key, 6)
    params = {}
    # conv stem (backbone stand-in), kaiming-ish normal, zero-padded to K_PAD
    wconv = jax.random.normal(ks[0], (KH, KW, CIN, F_BACKBONE), jnp.float32)
    wconv = wconv.reshape(K_RAW, F_BACKBONE) * (2.0 / K_RAW) ** 0.5
    params["w_conv"] = jnp.pad(wconv, ((0, K_PAD - K_RAW), (0, 0)))
    params["b_conv"] = jnp.zeros((1, F_BACKBONE), jnp.float32)
    # dense1 (LazyLinear F_BACKBONE -> 128), default-Linear-style uniform init
    bound = 1.0 / (F_BACKBONE ** 0.5)
    params["w1"] = jax.random.uniform(ks[1], (F_BACKBONE, D1), jnp.float32,
                                      -bound, bound)
    params["b1"] = jax.random.uniform(ks[2], (1, D1), jnp.float32, -bound, bound)
    # dense2 (140 -> 64), xavier normal, bias 0; stored transposed and split
    w2_t = xavier_normal(ks[3], D1 + META_DIM, D2)           # (140, 64)
    params["w2_feat"] = w2_t[:D1]                            # (128, 64)
    params["w2_meta"] = w2_t[D1:]                            # (12, 64)
    params["b2"] = jnp.zeros((1, D2), jnp.float32)
    # dense3 (64 -> 32), xavier normal, bias 0
    params["w3"] = xavier_normal(ks[4], D2, D3)
    params["b3"] = jnp.zeros((1, D3), jnp.float32)
    # dense4 (32 -> fc_dim), xavier normal, bias 0; stored as a (1, 32) row
    params["w4_row"] = xavier_normal(ks[5], D3, FC_DIM).T    # (1, 32)
    params["b4"] = jnp.zeros((1, FC_DIM), jnp.float32)
    return params


if __name__ == "__main__":
    key = jax.random.PRNGKey(0)
    k_img, k_meta, k_par = jax.random.split(key, 3)
    img = jax.random.normal(k_img, (N, CIN, H, W), jnp.float32)   # NCHW like PyTorch
    meta = jax.random.normal(k_meta, (N, META_DIM), jnp.float32)
    params = init_params(k_par)

    output, feature, meta_out = jax.jit(use_meta_forward)(img, meta, params)
    jax.block_until_ready((output, feature, meta_out))

    assert output.shape == (N, FC_DIM)
    assert feature.shape == (N, D1)
    assert meta_out.shape == (N, META_DIM)
    print("KERNEL_OK")
</pallas_src>

<mosaic_0001>
module attributes {stable_mosaic.version = 11 : i64} {
  func.func @use_meta_kernel(%arg0: memref<392x32xf32, #tpu.memory_space<vmem>>, %arg1: memref<2x392xf32, #tpu.memory_space<vmem>>, %arg2: memref<32x32xf32, #tpu.memory_space<vmem>>, %arg3: memref<1x32xf32, #tpu.memory_space<vmem>>, %arg4: memref<2x12xf32, #tpu.memory_space<vmem>>, %arg5: memref<32x128xf32, #tpu.memory_space<vmem>>, %arg6: memref<1x128xf32, #tpu.memory_space<vmem>>, %arg7: memref<128x64xf32, #tpu.memory_space<vmem>>, %arg8: memref<12x64xf32, #tpu.memory_space<vmem>>, %arg9: memref<1x64xf32, #tpu.memory_space<vmem>>, %arg10: memref<64x32xf32, #tpu.memory_space<vmem>>, %arg11: memref<1x32xf32, #tpu.memory_space<vmem>>, %arg12: memref<1x32xf32, #tpu.memory_space<vmem>>, %arg13: memref<1x1xf32, #tpu.memory_space<vmem>>, %arg14: memref<2x1xf32, #tpu.memory_space<vmem>>, %arg15: memref<2x128xf32, #tpu.memory_space<vmem>>) attributes {dimension_semantics = [], scalar_prefetch = 0 : i64, scratch_operands = 0 : i64, tpu.core_type = #tpu.core_type<tc>} {
    %c0 = arith.constant 0 : index
    %c0_0 = arith.constant 0 : index
    %0 = vector.load %arg0[%c0, %c0_0] : memref<392x32xf32, #tpu.memory_space<vmem>>, vector<392x32xf32>
    %c0_1 = arith.constant 0 : index
    %c0_2 = arith.constant 0 : index
    %1 = vector.load %arg2[%c0_1, %c0_2] : memref<32x32xf32, #tpu.memory_space<vmem>>, vector<32x32xf32>
    %cst = arith.constant dense<0.000000e+00> : vector<392x32xf32>
    %2 = tpu.matmul %0, %1, %cst {dimension_numbers = #tpu.dot_dimension_numbers<[1], [0], [0], [1], [0, 0, 1, 1], [], []>} : vector<392x32xf32>, vector<32x32xf32>, vector<392x32xf32> -> vector<392x32xf32>
    %c0_3 = arith.constant 0 : index
    %c0_4 = arith.constant 0 : index
    %3 = vector.load %arg3[%c0_3, %c0_4] : memref<1x32xf32, #tpu.memory_space<vmem>>, vector<1x32xf32>
    %4 = vector.broadcast %3 : vector<1x32xf32> to vector<392x32xf32>
    %5 = arith.addf %2, %4 : vector<392x32xf32>
    %cst_5 = arith.constant 0.000000e+00 : f32
    %6 = vector.broadcast %cst_5 : f32 to vector<392x32xf32>
    %7 = arith.maximumf %5, %6 : vector<392x32xf32>
    %c0_6 = arith.constant 0 : index
    %c0_7 = arith.constant 0 : index
    %8 = vector.load %arg1[%c0_6, %c0_7] : memref<2x392xf32, #tpu.memory_space<vmem>>, vector<2x392xf32>
    %cst_8 = arith.constant dense<0.000000e+00> : vector<2x32xf32>
    %9 = tpu.matmul %8, %7, %cst_8 {dimension_numbers = #tpu.dot_dimension_numbers<[1], [0], [0], [1], [0, 0, 1, 1], [], []>} : vector<2x392xf32>, vector<392x32xf32>, vector<2x32xf32> -> vector<2x32xf32>
    %c0_9 = arith.constant 0 : index
    %c0_10 = arith.constant 0 : index
    %10 = vector.load %arg5[%c0_9, %c0_10] : memref<32x128xf32, #tpu.memory_space<vmem>>, vector<32x128xf32>
    %cst_11 = arith.constant dense<0.000000e+00> : vector<2x128xf32>
    %11 = tpu.matmul %9, %10, %cst_11 {dimension_numbers = #tpu.dot_dimension_numbers<[1], [0], [0], [1], [0, 0, 1, 1], [], []>} : vector<2x32xf32>, vector<32x128xf32>, vector<2x128xf32> -> vector<2x128xf32>
    %c0_12 = arith.constant 0 : index
    %c0_13 = arith.constant 0 : index
    %12 = vector.load %arg6[%c0_12, %c0_13] : memref<1x128xf32, #tpu.memory_space<vmem>>, vector<1x128xf32>
    %13 = vector.broadcast %12 : vector<1x128xf32> to vector<2x128xf32>
    %14 = arith.addf %11, %13 : vector<2x128xf32>
    %c0_14 = arith.constant 0 : index
    %c0_15 = arith.constant 0 : index
    %15 = vector.load %arg15[%c0_14, %c0_15] : memref<2x128xf32, #tpu.memory_space<vmem>>, vector<2x128xf32>
    tpu.vector_store %arg15[%c0_14, %c0_15], %14 {strides = array<i32>} : memref<2x128xf32, #tpu.memory_space<vmem>>, vector<2x128xf32>,
    %c0_16 = arith.constant 0 : index
    %c0_17 = arith.constant 0 : index
    %16 = vector.load %arg7[%c0_16, %c0_17] : memref<128x64xf32, #tpu.memory_space<vmem>>, vector<128x64xf32>
    %cst_18 = arith.constant dense<0.000000e+00> : vector<2x64xf32>
    %17 = tpu.matmul %14, %16, %cst_18 {dimension_numbers = #tpu.dot_dimension_numbers<[1], [0], [0], [1], [0, 0, 1, 1], [], []>} : vector<2x128xf32>, vector<128x64xf32>, vector<2x64xf32> -> vector<2x64xf32>
    %c0_19 = arith.constant 0 : index
    %c0_20 = arith.constant 0 : index
    %18 = vector.load %arg4[%c0_19, %c0_20] : memref<2x12xf32, #tpu.memory_space<vmem>>, vector<2x12xf32>
    %c0_21 = arith.constant 0 : index
    %c0_22 = arith.constant 0 : index
    %19 = vector.load %arg8[%c0_21, %c0_22] : memref<12x64xf32, #tpu.memory_space<vmem>>, vector<12x64xf32>
    %cst_23 = arith.constant dense<0.000000e+00> : vector<2x64xf32>
    %20 = tpu.matmul %18, %19, %cst_23 {dimension_numbers = #tpu.dot_dimension_numbers<[1], [0], [0], [1], [0, 0, 1, 1], [], []>} : vector<2x12xf32>, vector<12x64xf32>, vector<2x64xf32> -> vector<2x64xf32>
    %21 = arith.addf %17, %20 : vector<2x64xf32>
    %c0_24 = arith.constant 0 : index
    %c0_25 = arith.constant 0 : index
    %22 = vector.load %arg9[%c0_24, %c0_25] : memref<1x64xf32, #tpu.memory_space<vmem>>, vector<1x64xf32>
    %23 = vector.broadcast %22 : vector<1x64xf32> to vector<2x64xf32>
    %24 = arith.addf %21, %23 : vector<2x64xf32>
    %c0_26 = arith.constant 0 : index
    %c0_27 = arith.constant 0 : index
    %25 = vector.load %arg10[%c0_26, %c0_27] : memref<64x32xf32, #tpu.memory_space<vmem>>, vector<64x32xf32>
    %cst_28 = arith.constant dense<0.000000e+00> : vector<2x32xf32>
    %26 = tpu.matmul %24, %25, %cst_28 {dimension_numbers = #tpu.dot_dimension_numbers<[1], [0], [0], [1], [0, 0, 1, 1], [], []>} : vector<2x64xf32>, vector<64x32xf32>, vector<2x32xf32> -> vector<2x32xf32>
    %c0_29 = arith.constant 0 : index
    %c0_30 = arith.constant 0 : index
    %27 = vector.load %arg11[%c0_29, %c0_30] : memref<1x32xf32, #tpu.memory_space<vmem>>, vector<1x32xf32>
    %28 = vector.broadcast %27 : vector<1x32xf32> to vector<2x32xf32>
    %29 = arith.addf %26, %28 : vector<2x32xf32>
    %c0_31 = arith.constant 0 : index
    %c0_32 = arith.constant 0 : index
    %30 = vector.load %arg12[%c0_31, %c0_32] : memref<1x32xf32, #tpu.memory_space<vmem>>, vector<1x32xf32>
    %31 = vector.broadcast %30 : vector<1x32xf32> to vector<2x32xf32>
    %32 = arith.mulf %29, %31 : vector<2x32xf32>
    %cst_33 = arith.constant dense<0.000000e+00> : vector<2xf32>
    %33 = vector.multi_reduction <add>, %32, %cst_33 [1] : vector<2x32xf32> to vector<2xf32>
    %34 = vector.shape_cast %33 : vector<2xf32> to vector<2x1xf32>
    %c0_34 = arith.constant 0 : index
    %c0_35 = arith.constant 0 : index
    %35 = vector.load %arg13[%c0_34, %c0_35] : memref<1x1xf32, #tpu.memory_space<vmem>>, vector<1x1xf32>
    %36 = vector.broadcast %35 : vector<1x1xf32> to vector<2x1xf32>
    %37 = arith.addf %34, %36 : vector<2x1xf32>
    %c0_36 = arith.constant 0 : index
    %c0_37 = arith.constant 0 : index
    %38 = vector.load %arg14[%c0_36, %c0_37] : memref<2x1xf32, #tpu.memory_space<vmem>>, vector<2x1xf32>
    tpu.vector_store %arg14[%c0_36, %c0_37], %37 {strides = array<i32>} : memref<2x1xf32, #tpu.memory_space<vmem>>, vector<2x1xf32>,
    return
  }
}

</mosaic_0001>

<bundles_post_ra>
// kernel: eq.11
= control target key start
LH: loop header
LB: loop body
LE: loop exit
PB: predicated region body
PF: predicated region fallthrough
CT: control target
= control target key end

     0   :  { %vm23_vm0 = vcmask 490496   ;;  %vm13_vm1 = vcmask 556032   ;;  %s50_s10 = smov 68   ;;  %vm27_vm2 = vcmask 64512   ;;  %vm30_vm3 = vcmask 1048096   ;;  %s72_s0 = inlined_call_operand.vmem [shape: s32[2,196], index: 0, kind: input, shape index: {}]   ;;  %s73_s1 = inlined_call_operand.vmem [shape: s32[392], index: 1, kind: output, shape index: {}]  }
   0x1   :  { %v48_v0 = vld [vmem:[%s72_s0 + $0x2] sm:$0x3]  ;;  %v9_v1 = vld [vmem:[%s72_s0] sm:$0x3]  ;;  %s21_s0 = smov 3 }
   0x2   :  { %8 = vst [vmem:[#allocation1 + $0x8] sm:$0x3] %v48_v0  ;;  %10 = vst [vmem:[#allocation1] sm:$0x3] %v9_v1 }
   0x9   :  { %v19_v2 = vld [vmem:[#allocation1 + $0x9] sm:$0x1]   ;;  %v16_v4 = vld [vmem:[#allocation1] sm:$0x1]   ;;  %v12_v6 = vld [vmem:[#allocation1 + $0x8] sm:$0x1]  }
   0xa   :  { %v22_v3 = vld [vmem:[#allocation1 + $0x1] ss:$8 sm:%s21_s0]   ;;  %17 = vst [vmem:[#allocation0] sm:$0x1] %v16_v4   ;;  %15 = vst.msk [vmem:[#allocation0 + $0x1] sm:$0x1] %vm13_vm1, %v12_v6  }
   0xb   :  { %v24_v5 = vsel %vm23_vm0, %v22_v3, %v19_v2  ;;  %v34_v7 = vld [vmem:[#allocation1 + $0x1] sm:$0x1]  }
   0xc   :  { %25 = vrot.lane.b32.xlu0 %v24_v5, %s50_s10 }
  0x10   :  { %35 = vrot.lane.b32.xlu0 %v34_v7, %s50_s10 }
  0x7e   :  { %v26_v8 = vpop.permute.xlu0 %25  }
  0x7f   :  { %29 = vst.msk [vmem:[#allocation0 + $0x3] sm:$0x1] %vm27_vm2, %v26_v8  }
  0x80   :  { %32 = vst.msk [vmem:[#allocation0 + $0x1] sm:$0x3] %vm30_vm3, %v26_v8  }
  0x82   :  { %v36_v9 = vpop.permute.xlu0 %35  }
  0x83   :  { %39 = vst.msk [vmem:[#allocation0 + $0x2] sm:$0x1] %vm13_vm1, %v36_v9  }
  0x8a   :  { %v44_v10 = vld [vmem:[#allocation0] sm:$0xf] }
  0x8b   :  { %47 = vst [vmem:[%s73_s1] sm:$0xf] %v44_v10 }

// kernel: use_meta_forward.1
= control target key start
LH: loop header
LB: loop body
LE: loop exit
PB: predicated region body
PF: predicated region fallthrough
CT: control target
= control target key end

     0   :  { %s2363_s0 = inlined_call_operand.vmem [shape: f32[392,32], index: 0, kind: input, shape index: {}]   ;;  %s2364_s1 = inlined_call_operand.vmem [shape: f32[2,392], index: 1, kind: input, shape index: {}]   ;;  %s2365_s2 = inlined_call_operand.vmem [shape: f32[32,32], index: 2, kind: input, shape index: {}]   ;;  %s2366_s3 = inlined_call_operand.vmem [shape: f32[1,32], index: 3, kind: input, shape index: {}]   ;;  %s2367_s4 = inlined_call_operand.vmem [shape: f32[2,12], index: 4, kind: input, shape index: {}]   ;;  %s2368_s5 = inlined_call_operand.vmem [shape: f32[32,128], index: 5, kind: input, shape index: {}]   ;;  %s2369_s6 = inlined_call_operand.vmem [shape: f32[1,128], index: 6, kind: input, shape index: {}]   ;;  %s2370_s7 = inlined_call_operand.vmem [shape: f32[128,64], index: 7, kind: input, shape index: {}]   ;;  %s2371_s8 = inlined_call_operand.vmem [shape: f32[12,64], index: 8, kind: input, shape index: {}]   ;;  %s2372_s9 = inlined_call_operand.vmem [shape: f32[1,64], index: 9, kind: input, shape index: {}]   ;;  %s2373_s10 = inlined_call_operand.vmem [shape: f32[64,32], index: 10, kind: input, shape index: {}]   ;;  %s2374_s11 = inlined_call_operand.vmem [shape: f32[1,32], index: 11, kind: input, shape index: {}]   ;;  %s2375_s12 = inlined_call_operand.vmem [shape: f32[1,32], index: 12, kind: input, shape index: {}]   ;;  %s2376_s13 = inlined_call_operand.<no memory space> [shape: f32[1,1], index: 13, kind: input, shape index: {}]   ;;  %s2377_s14 = inlined_call_operand.vmem [shape: f32[2,1], index: 14, kind: output, shape index: {0}]   ;;  %s2378_s15 = inlined_call_operand.hbm [shape: f32[2,128], index: 15, kind: output, shape index: {1}]  }
   0x1   :  { %v21_v0 = vstv %s2376_s13 }
   0x2   :  { %22 = vst [vmem:[#allocation2] sm:$0x1] %v21_v0 }
   0x3   :  { %v104_v1 = vld [vmem:[%s2365_s2 + $0x18] sm:$0xff]  ;;  %v1617_v2 = vmov 0.0   ;;  %v103_v3 = vld [vmem:[%s2365_s2 + $0x10] sm:$0xff]  ;;  %vm1618_vm0 = vmmov 0   ;;  %v102_v4 = vld [vmem:[%s2365_s2 + $0x8] sm:$0xff]  ;;  %vm112_vm1 = vcmask 261120  }
   0x4   :  { %1355 = vmatprep.subr.mxu0 %v1617_v2  ;;  %1363 = vmatprep.mubr.msk.f32.mxu0 %vm1618_vm0, %v1617_v2  ;;  %v101_v5 = vld [vmem:[%s2365_s2] sm:$0xff]  ;;  %v53_v7 = vld [vmem:[%s2363_s0 + $0x8] sm:$0xff]  ;;  %v90_v9 = vld [vmem:[%s2363_s0 + $0x130] sm:$0xff] }
   0x5   :  { %1356 = vmatpush3.msra.mxu0 %v104_v1  ;;  %1582 = vmatprep.subr.mxu1 %v1617_v2  ;;  %v52_v6 = vld [vmem:[%s2363_s0] sm:$0xff]  ;;  %v89_v8 = vld [vmem:[%s2363_s0 + $0x128] sm:$0xff]  ;;  %v54_v10 = vld [vmem:[%s2363_s0 + $0x10] sm:$0xff] }
   0x6   :  { %1357 = vmatprep.subr.mxu0 %v1617_v2  ;;  %1586 = vmatpush3.msra.mxu1 %v104_v1 }
   0x7   :  { %1358 = vmatpush3.msra.mxu0 %v103_v3  ;;  %1583 = vmatprep.subr.mxu1 %v1617_v2 }
   0x8   :  { %1359 = vmatprep.subr.mxu0 %v1617_v2  ;;  %1587 = vmatpush3.msra.mxu1 %v103_v3 }
   0x9   :  { %1360 = vmatpush3.msra.mxu0 %v102_v4  ;;  %1584 = vmatprep.subr.mxu1 %v1617_v2 }
   0xa   :  { %1361 = vmatprep.subr.mxu0 %v1617_v2  ;;  %1588 = vmatpush3.msra.mxu1 %v102_v4 }
   0xb   :  { %1362 = vmatpush3.msra.mxu0 %v101_v5  ;;  %1585 = vmatprep.subr.mxu1 %v1617_v2 }
   0xc   :  { %1364 = vmatmul.mubr.msk.f32.vlgmr.msra.gmra.mxu0 %vm112_vm1, %v52_v6  ;;  %1589 = vmatpush3.msra.mxu1 %v101_v5 }
   0xd   :  { %1366 = vmatprep.mubr.msk.f32.mxu0 %vm1618_vm0, %v1617_v2  ;;  %1474 = vmatprep.mubr.msk.f32.mxu1 %vm1618_vm0, %v1617_v2 }
   0xe   :  { %1475 = vmatmul.mubr.msk.f32.vlgmr.msra.gmra.mxu1 %vm112_vm1, %v89_v8 }
   0xf   :  { %1477 = vmatprep.mubr.msk.f32.mxu1 %vm1618_vm0, %v1617_v2 }
  0x10   :  { %1367 = vmatmul.mubr.msk.f32.gmra.mxu0 %vm112_vm1, %v53_v7 }
  0x11   :  { %1369 = vmatprep.mubr.msk.f32.mxu0 %vm1618_vm0, %v1617_v2 }
  0x12   :  { %1478 = vmatmul.mubr.msk.f32.gmra.mxu1 %vm112_vm1, %v90_v9 }
  0x13   :  { %23 = vsyncpa [#allocation4], 0  ;;  %1480 = vmatprep.mubr.msk.f32.mxu1 %vm1618_vm0, %v1617_v2  ;;  %v91_v11 = vld [vmem:[%s2363_s0 + $0x138] sm:$0xff]  ;;  %v92_v13 = vld [vmem:[%s2363_s0 + $0x140] sm:$0xff]  ;;  %vm641_vm2 = vcmask 64512   ;;  %vm892_vm3 = vcmask 1043456  }
  0x14   :  { %1370 = vmatmul.mubr.msk.f32.gmra.mxu0 %vm112_vm1, %v54_v10  ;;  %v55_v12 = vld [vmem:[%s2363_s0 + $0x18] sm:$0xff]  ;;  %v56_v14 = vld [vmem:[%s2363_s0 + $0x20] sm:$0xff]  ;;  %v93_v15 = vld [vmem:[%s2363_s0 + $0x148] sm:$0xff]  ;;  %vm888_vm4 = vcmask 97280   ;;  %vm1059_vm5 = vcmask 523264   ;;  %vm1141_vm6 = vcmask 254976  }
  0x15   :  { %1372 = vmatprep.mubr.msk.f32.mxu0 %vm1618_vm0, %v1617_v2  ;;  %v57_v16 = vld [vmem:[%s2363_s0 + $0x28] sm:$0xff]  ;;  %v94_v17 = vld [vmem:[%s2363_s0 + $0x150] sm:$0xff]  ;;  %v95_v19 = vld [vmem:[%s2363_s0 + $0x158] sm:$0xff] }
  0x16   :  { %1481 = vmatmul.mubr.msk.f32.gmra.mxu1 %vm112_vm1, %v91_v11  ;;  %v58_v18 = vld [vmem:[%s2363_s0 + $0x30] sm:$0xff]  ;;  %v59_v20 = vld [vmem:[%s2363_s0 + $0x38] sm:$0xff]  ;;  %v96_v21 = vld [vmem:[%s2363_s0 + $0x160] sm:$0xff] }
  0x17   :  { %1483 = vmatprep.mubr.msk.f32.mxu1 %vm1618_vm0, %v1617_v2  ;;  %v60_v22 = vld [vmem:[%s2363_s0 + $0x40] sm:$0xff]  ;;  %v97_v23 = vld [vmem:[%s2363_s0 + $0x168] sm:$0xff]  ;;  %v98_v25 = vld [vmem:[%s2363_s0 + $0x170] sm:$0xff] }
  0x18   :  { %1373 = vmatmul.mubr.msk.f32.gmra.mxu0 %vm112_vm1, %v55_v12  ;;  %v61_v24 = vld [vmem:[%s2363_s0 + $0x48] sm:$0xff]  ;;  %v62_v26 = vld [vmem:[%s2363_s0 + $0x50] sm:$0xff]  ;;  %v99_v27 = vld [vmem:[%s2363_s0 + $0x178] sm:$0xff] }
  0x19   :  { %1375 = vmatprep.mubr.msk.f32.mxu0 %vm1618_vm0, %v1617_v2  ;;  %v63_v28 = vld [vmem:[%s2363_s0 + $0x58] sm:$0xff]  ;;  %v100_v29 = vld [vmem:[%s2363_s0 + $0x180] sm:$0xff]  ;;  %v65_v31 = vld [vmem:[%s2363_s0 + $0x68] sm:$0xff] }
  0x1a   :  { %1484 = vmatmul.mubr.msk.f32.gmra.mxu1 %vm112_vm1, %v92_v13  ;;  %v64_v30 = vld [vmem:[%s2363_s0 + $0x60] sm:$0xff]  ;;  %v66_v32 = vld [vmem:[%s2363_s0 + $0x70] sm:$0xff]  ;;  %v67_v33 = vld [vmem:[%s2363_s0 + $0x78] sm:$0xff] }
  0x1b   :  { %1486 = vmatprep.mubr.msk.f32.mxu1 %vm1618_vm0, %v1617_v2  ;;  %v68_v34 = vld [vmem:[%s2363_s0 + $0x80] sm:$0xff]  ;;  %v69_v35 = vld [vmem:[%s2363_s0 + $0x88] sm:$0xff]  ;;  %v70_v36 = vld [vmem:[%s2363_s0 + $0x90] sm:$0xff] }
  0x1c   :  { %1376 = vmatmul.mubr.msk.f32.gmra.mxu0 %vm112_vm1, %v56_v14  ;;  %v71_v37 = vld [vmem:[%s2363_s0 + $0x98] sm:$0xff]  ;;  %v72_v38 = vld [vmem:[%s2363_s0 + $0xa0] sm:$0xff]  ;;  %v73_v39 = vld [vmem:[%s2363_s0 + $0xa8] sm:$0xff]  ;;  %v1619_v14 = vmov 1983009808  }
  0x1d   :  { %1378 = vmatprep.mubr.msk.f32.mxu0 %vm1618_vm0, %v1617_v2  ;;  %v74_v40 = vld [vmem:[%s2363_s0 + $0xb0] sm:$0xff]  ;;  %v75_v41 = vld [vmem:[%s2363_s0 + $0xb8] sm:$0xff]  ;;  %v76_v42 = vld [vmem:[%s2363_s0 + $0xc0] sm:$0xff] }
  0x1e   :  { %1487 = vmatmul.mubr.msk.f32.gmra.mxu1 %vm112_vm1, %v93_v15  ;;  %v77_v43 = vld [vmem:[%s2363_s0 + $0xc8] sm:$0xff]  ;;  %v78_v44 = vld [vmem:[%s2363_s0 + $0xd0] sm:$0xff]  ;;  %v79_v45 = vld [vmem:[%s2363_s0 + $0xd8] sm:$0xff]  ;;  %v623_v15 = vunpack.c.l.s4 %v1619_v14 }
  0x1f   :  { %1489 = vmatprep.mubr.msk.f32.mxu1 %vm1618_vm0, %v1617_v2  ;;  %v80_v46 = vld [vmem:[%s2363_s0 + $0xe0] sm:$0xff]  ;;  %v81_v47 = vld [vmem:[%s2363_s0 + $0xe8] sm:$0xff]  ;;  %v82_v48 = vld [vmem:[%s2363_s0 + $0xf0] sm:$0xff] }
  0x20   :  { %1379 = vmatmul.mubr.msk.f32.gmra.mxu0 %vm112_vm1, %v57_v16  ;;  %v83_v49 = vld [vmem:[%s2363_s0 + $0xf8] sm:$0xff]  ;;  %v84_v50 = vld [vmem:[%s2363_s0 + $0x100] sm:$0xff]  ;;  %v85_v51 = vld [vmem:[%s2363_s0 + $0x108] sm:$0xff]  ;;  %v625_v16 = vlaneseq }
  0x21   :  { %1381 = vmatprep.mubr.msk.f32.mxu0 %vm1618_vm0, %v1617_v2  ;;  %v86_v52 = vld [vmem:[%s2363_s0 + $0x110] sm:$0xff]  ;;  %v87_v53 = vld [vmem:[%s2363_s0 + $0x118] sm:$0xff]  ;;  %v88_v54 = vld [vmem:[%s2363_s0 + $0x120] sm:$0xff] }
  0x22   :  { %1490 = vmatmul.mubr.msk.f32.gmra.mxu1 %vm112_vm1, %v94_v17 }
  0x23   :  { %1492 = vmatprep.mubr.msk.f32.mxu1 %vm1618_vm0, %v1617_v2 }
  0x24   :  { %1382 = vmatmul.mubr.msk.f32.gmra.mxu0 %vm112_vm1, %v58_v18 }
  0x25   :  { %1384 = vmatprep.mubr.msk.f32.mxu0 %vm1618_vm0, %v1617_v2 }
  0x26   :  { %1493 = vmatmul.mubr.msk.f32.gmra.mxu1 %vm112_vm1, %v95_v19  ;;  %v624_v19 = vunpack.c.0.s8 %v623_v15 }
  0x27   :  { %1495 = vmatprep.mubr.msk.f32.mxu1 %vm1618_vm0, %v1617_v2 }
  0x28   :  { %1385 = vmatmul.mubr.msk.f32.gmra.mxu0 %vm112_vm1, %v59_v20  ;;  %v626_v20 = vshrl.u32 %v625_v16, 7 }
  0x29   :  { %1387 = vmatprep.mubr.msk.f32.mxu0 %vm1618_vm0, %v1617_v2 }
  0x2a   :  { %1496 = vmatmul.mubr.msk.f32.gmra.mxu1 %vm112_vm1, %v96_v21 }
  0x2b   :  { %1498 = vmatprep.mubr.msk.f32.mxu1 %vm1618_vm0, %v1617_v2 }
  0x2c   :  { %1388 = vmatmul.mubr.msk.f32.gmra.mxu0 %vm112_vm1, %v60_v22 }
  0x2d   :  { %1390 = vmatprep.mubr.msk.f32.mxu0 %vm1618_vm0, %v1617_v2 }
  0x2e   :  { %1499 = vmatmul.mubr.msk.f32.gmra.mxu1 %vm112_vm1, %v97_v23  ;;  %v627_v23 = vsub.s32 %v624_v19, %v626_v20 }
  0x2f   :  { %1501 = vmatprep.mubr.msk.f32.mxu1 %vm1618_vm0, %v1617_v2 }
  0x30   :  { %1391 = vmatmul.mubr.msk.f32.gmra.mxu0 %vm112_vm1, %v61_v24 }
  0x31   :  { %1393 = vmatprep.mubr.msk.f32.mxu0 %vm1618_vm0, %v1617_v2 }
  0x32   :  { %1502 = vmatmul.mubr.msk.f32.gmra.mxu1 %vm112_vm1, %v98_v25  ;;  %v619_v25 = vld [vmem:[%s2364_s1] sm:$0xff] }
  0x33   :  { %1504 = vmatprep.mubr.msk.f32.mxu1 %vm1618_vm0, %v1617_v2 }
  0x34   :  { %1394 = vmatmul.mubr.msk.f32.gmra.mxu0 %vm112_vm1, %v62_v26 }
  0x35   :  { %1396 = vmatprep.mubr.msk.f32.mxu0 %vm1618_vm0, %v1617_v2 }
  0x36   :  { %1505 = vmatmul.mubr.msk.f32.gmra.mxu1 %vm112_vm1, %v99_v27  ;;  %v2051_v27 = vrot.slane %v619_v25, %v627_v23 }
  0x37   :  { %1507 = vmatprep.mubr.msk.f32.mxu1 %vm1618_vm0, %v1617_v2 }
  0x38   :  { %1397 = vmatmul.mubr.msk.f32.gmra.mxu0 %vm112_vm1, %v63_v28 }
  0x39   :  { %1399 = vmatprep.mubr.msk.f32.mxu0 %vm1618_vm0, %v1617_v2 }
  0x3a   :  { %1508 = vmatmul.mubr.msk.f32.gmra.mxu1 %vm112_vm1, %v100_v29 }
  0x3c   :  { %1400 = vmatmul.mubr.msk.f32.gmra.mxu0 %vm112_vm1, %v64_v30  ;;  %v636_v30 = vcombine.high %v2051_v27, %v2051_v27 }
  0x3d   :  { %1402 = vmatprep.mubr.msk.f32.mxu0 %vm1618_vm0, %v1617_v2 }
  0x3e   :  { %708 = vmatprep.mubr.f32.mxu1 %v636_v30 }
  0x40   :  { %1403 = vmatmul.mubr.msk.f32.gmra.mxu0 %vm112_vm1, %v65_v31 }
  0x41   :  { %1405 = vmatprep.mubr.msk.f32.mxu0 %vm1618_vm0, %v1617_v2 }
  0x44   :  { %1406 = vmatmul.mubr.msk.f32.gmra.mxu0 %vm112_vm1, %v66_v32 }
  0x45   :  { %1408 = vmatprep.mubr.msk.f32.mxu0 %vm1618_vm0, %v1617_v2 }
  0x48   :  { %1409 = vmatmul.mubr.msk.f32.gmra.mxu0 %vm112_vm1, %v67_v33 }
  0x49   :  { %1411 = vmatprep.mubr.msk.f32.mxu0 %vm1618_vm0, %v1617_v2 }
  0x4c   :  { %1412 = vmatmul.mubr.msk.f32.gmra.mxu0 %vm112_vm1, %v68_v34 }
  0x4d   :  { %1414 = vmatprep.mubr.msk.f32.mxu0 %vm1618_vm0, %v1617_v2 }
  0x50   :  { %1415 = vmatmul.mubr.msk.f32.gmra.mxu0 %vm112_vm1, %v69_v35 }
  0x51   :  { %1417 = vmatprep.mubr.msk.f32.mxu0 %vm1618_vm0, %v1617_v2 }
  0x54   :  { %1418 = vmatmul.mubr.msk.f32.gmra.mxu0 %vm112_vm1, %v70_v36 }
  0x55   :  { %1420 = vmatprep.mubr.msk.f32.mxu0 %vm1618_vm0, %v1617_v2 }
  0x58   :  { %1421 = vmatmul.mubr.msk.f32.gmra.mxu0 %vm112_vm1, %v71_v37 }
  0x59   :  { %1423 = vmatprep.mubr.msk.f32.mxu0 %vm1618_vm0, %v1617_v2 }
  0x5c   :  { %1424 = vmatmul.mubr.msk.f32.gmra.mxu0 %vm112_vm1, %v72_v38 }
  0x5d   :  { %1426 = vmatprep.mubr.msk.f32.mxu0 %vm1618_vm0, %v1617_v2 }
  0x60   :  { %1427 = vmatmul.mubr.msk.f32.gmra.mxu0 %vm112_vm1, %v73_v39 }
  0x61   :  { %1429 = vmatprep.mubr.msk.f32.mxu0 %vm1618_vm0, %v1617_v2 }
  0x64   :  { %1430 = vmatmul.mubr.msk.f32.gmra.mxu0 %vm112_vm1, %v74_v40 }
  0x65   :  { %1432 = vmatprep.mubr.msk.f32.mxu0 %vm1618_vm0, %v1617_v2 }
  0x68   :  { %1433 = vmatmul.mubr.msk.f32.gmra.mxu0 %vm112_vm1, %v75_v41 }
  0x69   :  { %1435 = vmatprep.mubr.msk.f32.mxu0 %vm1618_vm0, %v1617_v2 }
  0x6c   :  { %1436 = vmatmul.mubr.msk.f32.gmra.mxu0 %vm112_vm1, %v76_v42 }
  0x6d   :  { %1438 = vmatprep.mubr.msk.f32.mxu0 %vm1618_vm0, %v1617_v2 }
  0x70   :  { %1439 = vmatmul.mubr.msk.f32.gmra.mxu0 %vm112_vm1, %v77_v43 }
  0x71   :  { %1441 = vmatprep.mubr.msk.f32.mxu0 %vm1618_vm0, %v1617_v2 }
  0x74   :  { %1442 = vmatmul.mubr.msk.f32.gmra.mxu0 %vm112_vm1, %v78_v44 }
  0x75   :  { %1444 = vmatprep.mubr.msk.f32.mxu0 %vm1618_vm0, %v1617_v2 }
  0x78   :  { %1445 = vmatmul.mubr.msk.f32.gmra.mxu0 %vm112_vm1, %v79_v45 }
  0x79   :  { %1447 = vmatprep.mubr.msk.f32.mxu0 %vm1618_vm0, %v1617_v2 }
  0x7c   :  { %1448 = vmatmul.mubr.msk.f32.gmra.mxu0 %vm112_vm1, %v80_v46 }
  0x7d   :  { %1450 = vmatprep.mubr.msk.f32.mxu0 %vm1618_vm0, %v1617_v2 }
  0x80   :  { %1451 = vmatmul.mubr.msk.f32.gmra.mxu0 %vm112_vm1, %v81_v47 }
  0x81   :  { %1453 = vmatprep.mubr.msk.f32.mxu0 %vm1618_vm0, %v1617_v2 }
  0x84   :  { %1454 = vmatmul.mubr.msk.f32.gmra.mxu0 %vm112_vm1, %v82_v48 }
  0x85   :  { %1456 = vmatprep.mubr.msk.f32.mxu0 %vm1618_vm0, %v1617_v2 }
  0x88   :  { %1457 = vmatmul.mubr.msk.f32.gmra.mxu0 %vm112_vm1, %v83_v49 }
  0x89   :  { %1459 = vmatprep.mubr.msk.f32.mxu0 %vm1618_vm0, %v1617_v2 }
  0x8c   :  { %1460 = vmatmul.mubr.msk.f32.gmra.mxu0 %vm112_vm1, %v84_v50 }
  0x8d   :  { %1462 = vmatprep.mubr.msk.f32.mxu0 %vm1618_vm0, %v1617_v2 }
  0x90   :  { %1463 = vmatmul.mubr.msk.f32.gmra.mxu0 %vm112_vm1, %v85_v51 }
  0x91   :  { %1465 = vmatprep.mubr.msk.f32.mxu0 %vm1618_vm0, %v1617_v2 }
  0x94   :  { %1466 = vmatmul.mubr.msk.f32.gmra.mxu0 %vm112_vm1, %v86_v52 }
  0x95   :  { %1468 = vmatprep.mubr.msk.f32.mxu0 %vm1618_vm0, %v1617_v2 }
  0x98   :  { %1469 = vmatmul.mubr.msk.f32.gmra.mxu0 %vm112_vm1, %v87_v53  ;;  %v621_v53 = vcombine.high %v619_v25, %v619_v25 }
  0x99   :  { %1471 = vmatprep.mubr.msk.f32.mxu0 %vm1618_vm0, %v1617_v2 }
  0x9c   :  { %1472 = vmatmul.mubr.msk.f32.gmra.mxu0 %vm112_vm1, %v88_v54 }
  0xcc   :  { %v2018_v55 = vpop.f32.mrf.mxu0 }
  0xce   :  { %v1365_v56 = vpop.f32.mrf.mxu0  ;;  %v2020_v57 = vpop.f32.mrf.mxu1 }
  0xd0   :  { %v2022_v58 = vpop.f32.mrf.mxu0  ;;  %v1476_v59 = vpop.f32.mrf.mxu1 }
  0xd2   :  { %v1368_v60 = vpop.f32.mrf.mxu0  ;;  %v2024_v61 = vpop.f32.mrf.mxu1 }
  0xd4   :  { %v2026_v62 = vpop.f32.mrf.mxu0  ;;  %v1479_v63 = vpop.f32.mrf.mxu1 }
  0xd5   :  { %v2073_v63 = vrot.slane %v621_v53, %v627_v23  ;;  %v2094_v53 = vld [vmem:[%s2366_s3] ss:$0 sm:$0xff] }
  0xd6   :  { %v1371_v0 = vpop.f32.mrf.mxu0  ;;  %v2028_v1 = vpop.f32.mrf.mxu1 }
  0xd8   :  { %v2030_v3 = vpop.f32.mrf.mxu0  ;;  %v1482_v4 = vpop.f32.mrf.mxu1 }
  0xda   :  { %v1374_v5 = vpop.f32.mrf.mxu0  ;;  %v2032_v6 = vpop.f32.mrf.mxu1 }
  0xdc   :  { %v2034_v7 = vpop.f32.mrf.mxu0  ;;  %v1485_v8 = vpop.f32.mrf.mxu1 }
  0xde   :  { %v1377_v9 = vpop.f32.mrf.mxu0  ;;  %v2036_v10 = vpop.f32.mrf.mxu1 }
  0xe0   :  { %v2038_v11 = vpop.f32.mrf.mxu0  ;;  %v1488_v12 = vpop.f32.mrf.mxu1 }
  0xe2   :  { %v1380_v13 = vpop.f32.mrf.mxu0  ;;  %v2040_v17 = vpop.f32.mrf.mxu1 }
  0xe4   :  { %v2042_v18 = vpop.f32.mrf.mxu0  ;;  %v1491_v21 = vpop.f32.mrf.mxu1 }
  0xe6   :  { %v1383_v22 = vpop.f32.mrf.mxu0  ;;  %v2044_v24 = vpop.f32.mrf.mxu1 }
  0xe8   :  { %v2049_v26 = vpop.f32.mrf.mxu0  ;;  %v1494_v28 = vpop.f32.mrf.mxu1 }
  0xea   :  { %v1386_v29 = vpop.f32.mrf.mxu0  ;;  %v2055_v31 = vpop.f32.mrf.mxu1 }
  0xec   :  { %v2057_v32 = vpop.f32.mrf.mxu0  ;;  %v1497_v33 = vpop.f32.mrf.mxu1 }
  0xee   :  { %v1389_v34 = vpop.f32.mrf.mxu0  ;;  %v2059_v35 = vpop.f32.mrf.mxu1 }
  0xf0   :  { %v2061_v36 = vpop.f32.mrf.mxu0  ;;  %v1500_v37 = vpop.f32.mrf.mxu1 }
  0xf2   :  { %v1392_v38 = vpop.f32.mrf.mxu0  ;;  %v2063_v39 = vpop.f32.mrf.mxu1 }
  0xf4   :  { %v2065_v40 = vpop.f32.mrf.mxu0  ;;  %v1503_v41 = vpop.f32.mrf.mxu1 }
  0xf6   :  { %v1395_v42 = vpop.f32.mrf.mxu0  ;;  %v2067_v43 = vpop.f32.mrf.mxu1 }
  0xf8   :  { %v2069_v44 = vpop.f32.mrf.mxu0  ;;  %v1506_v45 = vpop.f32.mrf.mxu1 }
  0xfa   :  { %v1398_v46 = vpop.f32.mrf.mxu0  ;;  %v2071_v54 = vpop.f32.mrf.mxu1 }
  0xfc   :  { %v386_v47 = vpop.f32.mrf.mxu0  ;;  %v1509_v59 = vpop.f32.mrf.mxu1 }
  0xfe   :  { %v1401_v48 = vpop.f32.mrf.mxu0 }
 0x100   :  { %v391_v49 = vpop.f32.mrf.mxu0 }
 0x102   :  { %v1404_v50 = vpop.f32.mrf.mxu0 }
 0x104   :  { %v396_v51 = vpop.f32.mrf.mxu0 }
 0x106   :  { %v1407_v52 = vpop.f32.mrf.mxu0 }
 0x108   :  { %v401_v56 = vpop.f32.mrf.mxu0 }
 0x109   :  { %v402_v59 = vadd.f32 %v2094_v53, %v401_v56  ;;  %v387_v56 = vadd.f32 %v2094_v53, %v386_v47  ;;  %v377_v47 = vadd.f32 %v2094_v53, %v2065_v40  ;;  %v367_v40 = vadd.f32 %v2094_v53, %v2057_v32 }
 0x10a   :  { %v1410_v60 = vpop.f32.mrf.mxu0  ;;  %v357_v32 = vadd.f32 %v2094_v53, %v2042_v18  ;;  %v347_v18 = vadd.f32 %v2094_v53, %v2034_v7  ;;  %v337_v7 = vadd.f32 %v2094_v53, %v2026_v62  ;;  %v327_v62 = vadd.f32 %v2094_v53, %v2018_v55 }
 0x10b   :  { %v637_v55 = vcombine.high %v2073_v63, %v2073_v63 }
 0x10c   :  { %v2075_v0 = vpop.f32.mrf.mxu0 }
 0x10e   :  { %v1413_v4 = vpop.f32.mrf.mxu0 }
 0x110   :  { %v2077_v5 = vpop.f32.mrf.mxu0 }
 0x112   :  { %v1416_v8 = vpop.f32.mrf.mxu0 }
 0x114   :  { %v2079_v9 = vpop.f32.mrf.mxu0 }
 0x116   :  { %v1419_v12 = vpop.f32.mrf.mxu0 }
 0x117   :  { %v397_v12 = vadd.f32 %v2094_v53, %v396_v51 }
 0x118   :  { %v2081_v13 = vpop.f32.mrf.mxu0 }
 0x11a   :  { %v1422_v14 = vpop.f32.mrf.mxu0 }
 0x11c   :  { %v2083_v15 = vpop.f32.mrf.mxu0 }
 0x11e   :  { %v1425_v16 = vpop.f32.mrf.mxu0 }
 0x120   :  { %v2085_v19 = vpop.f32.mrf.mxu0 }
 0x122   :  { %v1428_v20 = vpop.f32.mrf.mxu0 }
 0x124   :  { %v2087_v21 = vpop.f32.mrf.mxu0 }
 0x126   :  { %v1431_v22 = vpop.f32.mrf.mxu0 }
 0x127   :  { %v392_v22 = vadd.f32 %v2094_v53, %v391_v49 }
 0x128   :  { %v2089_v23 = vpop.f32.mrf.mxu0 }
 0x129   :  { %v583_v49 = vmax.f32 %v392_v22, 0.0 }
 0x12a   :  { %v1434_v25 = vpop.f32.mrf.mxu0 }
 0x12b   :  { %v585_v25 = vmax.f32 %v402_v59, 0.0  ;;  %v582_v59 = vmax.f32 %v387_v56, 0.0  ;;  %v578_v56 = vmax.f32 %v367_v40, 0.0  ;;  %v570_v40 = vmax.f32 %v327_v62, 0.0  ;;  %v875_v62 = vld [vmem:[%s2370_s7 + $0x30] sm:$0xff] }
 0x12c   :  { %v446_v28 = vpop.f32.mrf.mxu0 }
 0x12e   :  { %v1437_v29 = vpop.f32.mrf.mxu0 }
 0x130   :  { %v451_v30 = vpop.f32.mrf.mxu0 }
 0x132   :  { %v1440_v33 = vpop.f32.mrf.mxu0 }
 0x134   :  { %v456_v34 = vpop.f32.mrf.mxu0 }
 0x136   :  { %v1443_v37 = vpop.f32.mrf.mxu0 }
 0x138   :  { %v461_v38 = vpop.f32.mrf.mxu0 }
 0x139   :  { %v462_v51 = vadd.f32 %v2094_v53, %v461_v38  ;;  %v452_v38 = vadd.f32 %v2094_v53, %v451_v30  ;;  %v442_v30 = vadd.f32 %v2094_v53, %v2089_v23 }
 0x13a   :  { %v1446_v41 = vpop.f32.mrf.mxu0 }
 0x13b   :  { %v584_v41 = vmax.f32 %v397_v12, 0.0  ;;  %v595_v22 = vmax.f32 %v452_v38, 0.0 }
 0x13c   :  { %v466_v42 = vpop.f32.mrf.mxu0 }
 0x13d   :  { %v467_v33 = vadd.f32 %v2094_v53, %v466_v42  ;;  %v457_v42 = vadd.f32 %v2094_v53, %v456_v34  ;;  %v447_v34 = vadd.f32 %v2094_v53, %v446_v28  ;;  %v437_v28 = vadd.f32 %v2094_v53, %v2087_v21 }
 0x13e   :  { %v1449_v45 = vpop.f32.mrf.mxu0  ;;  %v427_v21 = vadd.f32 %v2094_v53, %v2083_v15  ;;  %v417_v15 = vadd.f32 %v2094_v53, %v2079_v9  ;;  %v407_v9 = vadd.f32 %v2094_v53, %v2075_v0  ;;  %v557_v0 = vadd.f32 %v2094_v53, %v2063_v39 }
 0x13f   :  { %v542_v39 = vadd.f32 %v2094_v53, %v2044_v24  ;;  %v527_v24 = vadd.f32 %v2094_v53, %v2032_v6  ;;  %v512_v6 = vadd.f32 %v2094_v53, %v2020_v57 }
 0x140   :  { %v471_v46 = vpop.f32.mrf.mxu0 }
 0x141   :  { %v472_v16 = vadd.f32 %v2094_v53, %v471_v46  ;;  %v382_v46 = vadd.f32 %v2094_v53, %v2069_v44  ;;  %v372_v44 = vadd.f32 %v2094_v53, %v2061_v36  ;;  %v362_v36 = vadd.f32 %v2094_v53, %v2049_v26 }
 0x142   :  { %v1452_v48 = vpop.f32.mrf.mxu0  ;;  %v352_v26 = vadd.f32 %v2094_v53, %v2038_v11  ;;  %v342_v11 = vadd.f32 %v2094_v53, %v2030_v3  ;;  %v332_v3 = vadd.f32 %v2094_v53, %v2022_v58  ;;  %v586_v58 = vmax.f32 %v407_v9, 0.0  ;;  %v877_v9 = vld [vmem:[%s2370_s7 + $0x40] sm:$0xff] }
 0x143   :  { %v599_v48 = vmax.f32 %v472_v16, 0.0  ;;  %v580_v16 = vmax.f32 %v377_v47, 0.0 }
 0x144   :  { %v476_v50 = vpop.f32.mrf.mxu0  ;;  %v575_v47 = vmax.f32 %v352_v26, 0.0 }
 0x145   :  { %v477_v4 = vadd.f32 %v2094_v53, %v476_v50 }
 0x146   :  { %v1455_v52 = vpop.f32.mrf.mxu0 }
 0x147   :  { %v600_v37 = vmax.f32 %v477_v4, 0.0  ;;  %v598_v52 = vmax.f32 %v467_v33, 0.0  ;;  %v597_v4 = vmax.f32 %v462_v51, 0.0  ;;  %v577_v51 = vmax.f32 %v362_v36, 0.0 }
 0x148   :  { %v481_v60 = vpop.f32.mrf.mxu0 }
 0x149   :  { %v482_v8 = vadd.f32 %v2094_v53, %v481_v60 }
 0x14a   :  { %v1458_v14 = vpop.f32.mrf.mxu0 }
 0x14b   :  { %v601_v20 = vmax.f32 %v482_v8, 0.0  ;;  %v581_v8 = vmax.f32 %v382_v46, 0.0  ;;  %v596_v14 = vmax.f32 %v457_v42, 0.0  ;;  %v592_v46 = vmax.f32 %v437_v28, 0.0 }
 0x14c   :  { %v2102_v29 = vpop.f32.mrf.mxu0  ;;  %v422_v42 = vadd.f32 %v2094_v53, %v2081_v13  ;;  %v412_v13 = vadd.f32 %v2094_v53, %v2077_v5  ;;  %v562_v5 = vadd.f32 %v2094_v53, %v2067_v43  ;;  %v552_v43 = vadd.f32 %v2094_v53, %v2059_v35 }
 0x14d   :  { %1286 = vmatprep.subr.mxu1 %v601_v20  ;;  %v537_v35 = vadd.f32 %v2094_v53, %v2040_v17  ;;  %v522_v17 = vadd.f32 %v2094_v53, %v2028_v1 }
 0x14e   :  { %1287 = vmatpush3.msra.mxu1 %v585_v25  ;;  %v1461_v45 = vpop.f32.mrf.mxu0  ;;  %v579_v25 = vmax.f32 %v372_v44, 0.0  ;;  %v589_v38 = vmax.f32 %v422_v42, 0.0  ;;  %v588_v44 = vmax.f32 %v417_v15, 0.0  ;;  %v885_v15 = vld [vmem:[%s2367_s4] sm:$0x3] }
 0x14f   :  { %1288 = vmatprep.subr.mxu1 %v600_v37  ;;  %v594_v37 = vmax.f32 %v447_v34, 0.0  ;;  %v593_v45 = vmax.f32 %v442_v30, 0.0  ;;  %v587_v34 = vmax.f32 %v412_v13, 0.0  ;;  %v616_v30 = vmax.f32 %v557_v0, 0.0  ;;  %v881_v13 = vld [vmem:[%s2370_s7 + $0x60] sm:$0xff] }
 0x150   :  { %1289 = vmatpush3.msra.mxu1 %v584_v41  ;;  %v2109_v50 = vpop.f32.mrf.mxu0  ;;  %v432_v41 = vadd.f32 %v2094_v53, %v2085_v19  ;;  %v1224_v0 = vld [vmem:[%s2369_s6] ss:$0 sm:$0xff] }
 0x151   :  { %1290 = vmatprep.subr.mxu1 %v599_v48 }
 0x152   :  { %1291 = vmatpush3.msra.mxu1 %v583_v49  ;;  %v1464_v60 = vpop.f32.mrf.mxu0  ;;  %v576_v49 = vmax.f32 %v357_v32, 0.0  ;;  %v609_v32 = vmax.f32 %v522_v17, 0.0 }
 0x153   :  { %1292 = vmatprep.subr.mxu1 %v598_v52  ;;  %v591_v52 = vmax.f32 %v432_v41, 0.0  ;;  %v574_v60 = vmax.f32 %v347_v18, 0.0 }
 0x154   :  { %1293 = vmatpush3.msra.mxu1 %v582_v59  ;;  %v2117_v12 = vpop.f32.mrf.mxu0  ;;  %v590_v59 = vmax.f32 %v427_v21, 0.0 }
 0x155   :  { %1294 = vmatprep.subr.mxu1 %v597_v4  ;;  %v573_v4 = vmax.f32 %v342_v11, 0.0  ;;  %v497_v57 = vadd.f32 %v2094_v53, %v2117_v12 }
 0x156   :  { %1295 = vmatpush3.msra.mxu1 %v581_v8  ;;  %v1467_v20 = vpop.f32.mrf.mxu0  ;;  %v572_v8 = vmax.f32 %v337_v7, 0.0  ;;  %v883_v7 = vld [vmem:[%s2370_s7 + $0x70] sm:$0xff] }
 0x157   :  { %1296 = vmatprep.subr.mxu1 %v596_v14  ;;  %v571_v14 = vmax.f32 %v332_v3, 0.0  ;;  %v547_v20 = vadd.f32 %v2094_v53, %v2055_v31  ;;  %v613_v31 = vmax.f32 %v542_v39, 0.0  ;;  %v879_v3 = vld [vmem:[%s2370_s7 + $0x50] sm:$0xff] }
 0x158   :  { %1297 = vmatpush3.msra.mxu1 %v580_v16  ;;  %v2126_v33 = vpop.f32.mrf.mxu0  ;;  %v617_v16 = vmax.f32 %v562_v5, 0.0  ;;  %v873_v5 = vld [vmem:[%s2370_s7 + $0x20] sm:$0xff] }
 0x159   :  { %1298 = vmatprep.subr.mxu1 %v595_v22  ;;  %v615_v22 = vmax.f32 %v552_v43, 0.0  ;;  %v614_v36 = vmax.f32 %v547_v20, 0.0  ;;  %v1051_v43 = vld [vmem:[%s2373_s10 + $0x38] sm:$0xff] }
 0x15a   :  { %1299 = vmatpush3.msra.mxu1 %v579_v25  ;;  %v1470_v23 = vpop.f32.mrf.mxu0  ;;  %v612_v25 = vmax.f32 %v537_v35, 0.0 }
 0x15b   :  { %1300 = vmatprep.subr.mxu1 %v594_v37  ;;  %v610_v37 = vmax.f32 %v527_v24, 0.0  ;;  %v607_v23 = vmax.f32 %v512_v6, 0.0  ;;  %v1045_v24 = vld [vmem:[%s2373_s10 + $0x8] sm:$0xff] }
 0x15c   :  { %1301 = vmatpush3.msra.mxu1 %v578_v56  ;;  %v2136_v48 = vpop.f32.mrf.mxu0 }
 0x15d   :  { %1302 = vmatprep.subr.mxu1 %v593_v45  ;;  %v507_v56 = vadd.f32 %v2094_v53, %v2136_v48  ;;  %v492_v45 = vadd.f32 %v2094_v53, %v2109_v50  ;;  %v567_v48 = vadd.f32 %v2094_v53, %v2071_v54  ;;  %v787_v54 = vld [vmem:[%s2368_s5 + $0x18] sm:$0xff] }
 0x15e   :  { %1303 = vmatpush3.msra.mxu1 %v577_v51  ;;  %v1473_v19 = vpop.f32.mrf.mxu0  ;;  %v604_v51 = vmax.f32 %v497_v57, 0.0 }
 0x15f   :  { %1304 = vmatprep.subr.mxu1 %v592_v46  ;;  %v606_v41 = vmax.f32 %v507_v56, 0.0  ;;  %v603_v12 = vmax.f32 %v492_v45, 0.0  ;;  %v618_v50 = vmax.f32 %v567_v48, 0.0  ;;  %v1231_v56 = vld [vmem:[%s2375_s12] ss:$0 sm:$0xff] }
 0x160   :  { %1305 = vmatpush3.msra.mxu1 %v576_v49 }
 0x161   :  { %1306 = vmatprep.subr.mxu1 %v591_v52  ;;  %v887_v52 = vld [vmem:[%s2371_s8 + $0x8] sm:$0xf] }
 0x162   :  { %1307 = vmatpush3.msra.mxu1 %v575_v47  ;;  %v886_v47 = vld [vmem:[%s2371_s8] sm:$0xff] }
 0x163   :  { %1308 = vmatprep.subr.mxu1 %v590_v59  ;;  %v884_v59 = vld [vmem:[%s2370_s7 + $0x78] sm:$0xff] }
 0x164   :  { %1309 = vmatpush3.msra.mxu1 %v574_v60  ;;  %v882_v60 = vld [vmem:[%s2370_s7 + $0x68] sm:$0xff] }
 0x165   :  { %1310 = vmatprep.subr.mxu1 %v589_v38  ;;  %v880_v38 = vld [vmem:[%s2370_s7 + $0x58] sm:$0xff] }
 0x166   :  { %1311 = vmatpush3.msra.mxu1 %v573_v4  ;;  %v878_v4 = vld [vmem:[%s2370_s7 + $0x48] sm:$0xff] }
 0x167   :  { %1312 = vmatprep.subr.mxu1 %v588_v44  ;;  %v876_v44 = vld [vmem:[%s2370_s7 + $0x38] sm:$0xff] }
 0x168   :  { %1313 = vmatpush3.msra.mxu1 %v572_v8  ;;  %v874_v8 = vld [vmem:[%s2370_s7 + $0x28] sm:$0xff] }
 0x169   :  { %1314 = vmatprep.subr.mxu1 %v587_v34  ;;  %v872_v34 = vld [vmem:[%s2370_s7 + $0x18] sm:$0xff] }
 0x16a   :  { %1315 = vmatpush3.msra.mxu1 %v571_v14  ;;  %v871_v14 = vld [vmem:[%s2370_s7 + $0x10] sm:$0xff] }
 0x16b   :  { %1316 = vmatprep.subr.mxu1 %v586_v58  ;;  %v870_v58 = vld [vmem:[%s2370_s7 + $0x8] sm:$0xff] }
 0x16c   :  { %1317 = vmatpush3.msra.mxu1 %v570_v40  ;;  %v869_v40 = vld [vmem:[%s2370_s7] sm:$0xff] }
 0x16d   :  { %714 = vmatprep.subr.mxu1 %v1617_v2  ;;  %709 = vmatmul.mubr.f32.vlgmr.msra.gmra.mxu1 %v2051_v27  ;;  %v532_v27 = vadd.f32 %v2094_v53, %v2036_v10  ;;  %v517_v10 = vadd.f32 %v2094_v53, %v2024_v61  ;;  %v502_v61 = vadd.f32 %v2094_v53, %v2126_v33 }
 0x16e   :  { %715 = vmatpush1.msra.mxu1 %v617_v16  ;;  %1223 = vmatprep.mubr.msk.f32.mxu1 %vm641_vm2, %v637_v55  ;;  %v487_v33 = vadd.f32 %v2094_v53, %v2102_v29  ;;  %v786_v53 = vld [vmem:[%s2368_s5 + $0x10] sm:$0xff]  ;;  %v784_v29 = vld [vmem:[%s2368_s5] sm:$0xff] }
 0x16f   :  { %716 = vmatprep.subr.mxu1 %v1617_v2  ;;  %v611_v28 = vmax.f32 %v532_v27, 0.0  ;;  %v608_v1 = vmax.f32 %v517_v10, 0.0  ;;  %v605_v26 = vmax.f32 %v502_v61, 0.0  ;;  %v1047_v27 = vld [vmem:[%s2373_s10 + $0x18] sm:$0xff] }
 0x170   :  { %717 = vmatpush1.msra.mxu1 %v616_v30  ;;  %v602_v21 = vmax.f32 %v487_v33, 0.0  ;;  %v1050_v30 = vld [vmem:[%s2373_s10 + $0x30] sm:$0xff] }
 0x171   :  { %718 = vmatprep.subr.mxu1 %v1617_v2 }
 0x172   :  { %719 = vmatpush1.msra.mxu1 %v615_v22  ;;  %v1049_v22 = vld [vmem:[%s2373_s10 + $0x28] sm:$0xff] }
 0x173   :  { %720 = vmatprep.subr.mxu1 %v1617_v2 }
 0x174   :  { %721 = vmatpush1.msra.mxu1 %v614_v36  ;;  %v1048_v36 = vld [vmem:[%s2373_s10 + $0x20] sm:$0xff] }
 0x175   :  { %722 = vmatprep.subr.mxu1 %v1617_v2 }
 0x176   :  { %723 = vmatpush1.msra.mxu1 %v613_v31  ;;  %v1046_v31 = vld [vmem:[%s2373_s10 + $0x10] sm:$0xff] }
 0x177   :  { %724 = vmatprep.subr.mxu1 %v1617_v2 }
 0x178   :  { %725 = vmatpush1.msra.mxu1 %v612_v25  ;;  %v1044_v25 = vld [vmem:[%s2373_s10] sm:$0xff] }
 0x179   :  { %726 = vmatprep.subr.mxu1 %v1617_v2 }
 0x17a   :  { %727 = vmatpush1.msra.mxu1 %v611_v28  ;;  %v1228_v28 = vld [vmem:[%s2372_s9] ss:$0 sm:$0xff]  ;;  %s1620_s9 = smov [#allocation3]  }
 0x17b   :  { %728 = vmatprep.subr.mxu1 %v1617_v2  ;;  %s1163_s10 = sshll.u32 %s1620_s9, 4  ;;  %s1164_s10 = int_to_ptr.vmem [resolvable:$true] %s1163_s10 }
 0x17c   :  { %729 = vmatpush1.msra.mxu1 %v610_v37  ;;  %s1595_s24 = scalar_lea.vmem %s1164_s10, 32  ;;  %p1600_p1 = scmp.lt.s32.totalorder %s1164_s10, %s1164_s10 }
 0x17d   :  { %730 = vmatprep.subr.mxu1 %v1617_v2  ;;  %p1596_p0 = scmp.ne.s32.totalorder %s1164_s10, %s1595_s24  ;;  %p1601_p2 = scmp.lt.s32.totalorder %s1595_s24, %s1595_s24 }
 0x17e   :  { %731 = vmatpush1.msra.mxu1 %v609_v32  ;;  %v1229_v32 = vld [vmem:[%s2374_s11] ss:$0 sm:$0xff] }
 0x17f   :  { %732 = vmatprep.subr.mxu1 %v1617_v2  ;;  %p1602_p3 = por %p1601_p2, %p1600_p1 }
 0x180   :  { %733 = vmatpush1.msra.mxu1 %v608_v1 }
 0x181   :  { %734 = vmatprep.subr.mxu1 %v1617_v2  ;;  %p1603_p4 = pnand %p1602_p3, %p1596_p0 }
 0x182   :  { %735 = vmatpush1.msra.mxu1 %v607_v23 }
 0x183   :  { %736 = vmatprep.subr.mxu1 %v1617_v2 }
 0x184   :  { %737 = vmatpush1.msra.mxu1 %v606_v41 }
 0x185   :  { %738 = vmatprep.subr.mxu1 %v1617_v2 }
 0x186   :  { %739 = vmatpush1.msra.mxu1 %v605_v26 }
 0x187   :  { %740 = vmatprep.subr.mxu1 %v1617_v2 }
 0x188   :  { %741 = vmatpush1.msra.mxu1 %v604_v51 }
 0x189   :  { %742 = vmatprep.subr.mxu1 %v1617_v2 }
 0x18a   :  { %743 = vmatpush1.msra.mxu1 %v603_v12 }
 0x18b   :  { %744 = vmatprep.subr.mxu1 %v1617_v2 }
 0x18c   :  { %745 = vmatpush1.msra.mxu1 %v602_v21 }
 0x18d   :  { %776 = vmatprep.subr.mxu1 %v1617_v2 }
 0x18e   :  { %777 = vmatpush2.msra.mxu1 %v618_v50 }
 0x18f   :  { %779 = vmatmul.mubr.f32.vlgmr.msra.gmra.mxu1 %v2073_v63  ;;  %1510 = vmatprep.subr.mxu1 %v1617_v2  ;;  %v785_v63 = vld [vmem:[%s2368_s5 + $0x8] sm:$0xff] }
 0x190   :  { %1518 = vmatprep.mubr.msk.f32.mxu1 %vm1618_vm0, %v1617_v2  ;;  %1511 = vmatpush3.msra.mxu1 %v787_v54 }
 0x191   :  { %1512 = vmatprep.subr.mxu1 %v1617_v2 }
 0x192   :  { %1513 = vmatpush3.msra.mxu1 %v786_v53 }
 0x193   :  { %1514 = vmatprep.subr.mxu1 %v1617_v2 }
 0x194   :  { %1515 = vmatpush3.msra.mxu1 %v785_v63 }
 0x195   :  { %1516 = vmatprep.subr.mxu1 %v1617_v2 }
 0x196   :  { %1517 = vmatpush3.msra.mxu1 %v784_v29 }
 0x197   :  { %1521 = vmatprep.subr.mxu1 %v1617_v2 }
 0x22d   :  { %v1318_v46 = vpop.f32.mrf.mxu1 }
 0x22f   :  { %v1319_v18 = vpop.f32.mrf.mxu1 }
 0x230   :  { %v1320_v49 = vadd.f32 %v1319_v18, %v1318_v46 }
 0x24f   :  { %v780_v19 = vpop.f32.mrf.mxu1 }
 0x250   :  { %v781_v42 = vadd.f32 %v1320_v49, %v780_v19 }
 0x251   :  { %v782_v11 = vpop.f32.mrf.mxu1 }
 0x252   :  { %1519 = vmatmul.mubr.msk.f32.vlgmr.msra.gmra.mxu1 %vm112_vm1, %v781_v42 }
 0x253   :  { %1522 = vmatpush3.msk.msra.mxu1 %vm892_vm3, %v887_v52  ;;  %1525 = vmatprep.mubr.msk.f32.mxu1 %vm1618_vm0, %v1617_v2 }
 0x254   :  { %1523 = vmatprep.subr.mxu1 %v1617_v2 }
 0x255   :  { %1524 = vmatpush3.msra.mxu1 %v886_v47 }
 0x256   :  { %1528 = vmatprep.subr.mxu1 %v1617_v2  ;;  %1526 = vmatmul.mubr.msk.f32.vlgmr.msra.gmra.mxu1 %vm888_vm4, %v885_v15 }
 0x257   :  { %1529 = vmatpush3.msra.mxu1 %v884_v59  ;;  %1560 = vmatprep.mubr.msk.f32.mxu1 %vm1618_vm0, %v1617_v2 }
 0x258   :  { %1530 = vmatprep.subr.mxu1 %v1617_v2 }
 0x259   :  { %1531 = vmatpush3.msra.mxu1 %v883_v7 }
 0x25a   :  { %1532 = vmatprep.subr.mxu1 %v1617_v2 }
 0x25b   :  { %1533 = vmatpush3.msra.mxu1 %v882_v60 }
 0x25c   :  { %1534 = vmatprep.subr.mxu1 %v1617_v2 }
 0x25d   :  { %1535 = vmatpush3.msra.mxu1 %v881_v13 }
 0x25e   :  { %1536 = vmatprep.subr.mxu1 %v1617_v2 }
 0x25f   :  { %1537 = vmatpush3.msra.mxu1 %v880_v38 }
 0x260   :  { %1538 = vmatprep.subr.mxu1 %v1617_v2 }
 0x261   :  { %1539 = vmatpush3.msra.mxu1 %v879_v3 }
 0x262   :  { %1540 = vmatprep.subr.mxu1 %v1617_v2 }
 0x263   :  { %1541 = vmatpush3.msra.mxu1 %v878_v4 }
 0x264   :  { %1542 = vmatprep.subr.mxu1 %v1617_v2 }
 0x265   :  { %1543 = vmatpush3.msra.mxu1 %v877_v9 }
 0x266   :  { %1544 = vmatprep.subr.mxu1 %v1617_v2 }
 0x267   :  { %1545 = vmatpush3.msra.mxu1 %v876_v44 }
 0x268   :  { %1546 = vmatprep.subr.mxu1 %v1617_v2 }
 0x269   :  { %1547 = vmatpush3.msra.mxu1 %v875_v62 }
 0x26a   :  { %1548 = vmatprep.subr.mxu1 %v1617_v2 }
 0x26b   :  { %1549 = vmatpush3.msra.mxu1 %v874_v8 }
 0x26c   :  { %1550 = vmatprep.subr.mxu1 %v1617_v2 }
 0x26d   :  { %1551 = vmatpush3.msra.mxu1 %v873_v5 }
 0x26e   :  { %1552 = vmatprep.subr.mxu1 %v1617_v2 }
 0x26f   :  { %1553 = vmatpush3.msra.mxu1 %v872_v34 }
 0x270   :  { %1554 = vmatprep.subr.mxu1 %v1617_v2 }
 0x271   :  { %1555 = vmatpush3.msra.mxu1 %v871_v14 }
 0x272   :  { %1556 = vmatprep.subr.mxu1 %v1617_v2 }
 0x273   :  { %1557 = vmatpush3.msra.mxu1 %v870_v58 }
 0x274   :  { %1558 = vmatprep.subr.mxu1 %v1617_v2 }
 0x275   :  { %1559 = vmatpush3.msra.mxu1 %v869_v40 }
 0x276   :  { %1563 = vmatprep.subr.mxu1 %v1617_v2 }
 0x312   :  { %v864_v16 = vpop.f32.mrf.mxu1 }
 0x313   :  { %v865_v55 = vadd.f32 %v1224_v0, %v864_v16 }
 0x314   :  { %v1520_v20 = vpop.f32.mrf.mxu1 }
 0x315   :  { %868 = vst [vmem:[#allocation3] sm:$0x3] %v865_v55  ;;  %1561 = vmatmul.mubr.f32.vlgmr.msra.gmra.mxu1 %v865_v55 }
 0x316   :  { %v962_v39 = vpop.f32.mrf.mxu1  ;;  %1564 = vmatpush3.msra.mxu1 %v1051_v43  ;;  %1579 = vmatprep.mubr.msk.f32.mxu1 %vm1618_vm0, %v1617_v2 }
 0x317   :  { %1565 = vmatprep.subr.mxu1 %v1617_v2 }
 0x318   :  { %v1527_v35 = vpop.f32.mrf.mxu1  ;;  %1566 = vmatpush3.msra.mxu1 %v1050_v30 }
 0x319   :  { %1567 = vmatprep.subr.mxu1 %v1617_v2 }
 0x31a   :  { %1568 = vmatpush3.msra.mxu1 %v1049_v22 }
 0x31b   :  { %1569 = vmatprep.subr.mxu1 %v1617_v2 }
 0x31c   :  { %1570 = vmatpush3.msra.mxu1 %v1048_v36 }
 0x31d   :  { %1571 = vmatprep.subr.mxu1 %v1617_v2 }
 0x31e   :  { %1572 = vmatpush3.msra.mxu1 %v1047_v27 }
 0x31f   :  { %1573 = vmatprep.subr.mxu1 %v1617_v2 }
 0x320   :  { %1574 = vmatpush3.msra.mxu1 %v1046_v31 }
 0x321   :  { %1575 = vmatprep.subr.mxu1 %v1617_v2 }
 0x322   :  { %1576 = vmatpush3.msra.mxu1 %v1045_v24 }
 0x323   :  { %1577 = vmatprep.subr.mxu1 %v1617_v2 }
 0x324   :  { %1578 = vmatpush3.msra.mxu1 %v1044_v25 }
 0x3d5   :  { %v1032_v17 = vpop.f32.mrf.mxu1 }
 0x3d6   :  { %v1033_v10 = vadd.f32 %v1032_v17, %v962_v39 }
 0x3d7   :  { %v1562_v37 = vpop.f32.mrf.mxu1 }
 0x3d8   :  { %v1043_v6 = vadd.f32 %v1228_v28, %v1033_v10 }
 0x3da   :  { %1580 = vmatmul.mubr.msk.f32.vlgmr.msra.gmra.mxu1 %vm1059_vm5, %v1043_v6 }
 0x49a   :  { %v1129_v2 = vpop.f32.mrf.mxu1 }
 0x49b   :  { %v1130_v1 = vadd.f32 %v1229_v32, %v1129_v2 }
 0x49c   :  { %v1581_v23 = vpop.f32.mrf.mxu1 }
 0x49d   :  { %v1140_v61 = vmul.f32 %v1231_v56, %v1130_v1 }
 0x49f   :  { %v1142_v41 = vsel %vm1141_vm6, %v1140_v61, 0.0 }
 0x4a0   :  { %1143 = vadd.xlane.f32.xlu0 %v1142_v41 }
 0x4a1   :  { %1606 = shalt.err (!%p1603_p4)
}
 0x4a2   :  { %1166 = dma.vmem_to_hbm [thread:$0]  %s1164_s10, 32, %s2378_s15, [#allocation4]   ;;  %v1232_v57 = vld [vmem:[#allocation2] ss:$0 sm:$0xff]  ;;  %vm1153_vm7 = vcmask 1024  }
 0x529   :  { %v1144_v45 = vpop.xlane.xlu0 %1143 }
 0x52a   :  { %v1152_v26 = vadd.f32 %v1232_v57, %v1144_v45 }
 0x52c   :  { %1154 = vst.msk [vmem:[%s2377_s14] sm:$0x3] %vm1153_vm7, %v1152_v26 }
 0x52d   :  { %1615 = dma.done.wait [#allocation4], 32  }
 0x52e   :  { %1616 = vsyncadd [#allocation4], 4294967264 }
 0x52f   :  { %1172 = vsyncpa [#allocation4], 1 }

</bundles_post_ra>
